<compile_context>
chip_gen: v6e
topology: v6e:2x2x1
jax: 0.10.0
libtpu: 0.0.40
codegen_flags: <defaults>
</compile_context>

<pallas_src>
import jax
import jax.numpy as jnp
from jax.experimental import pallas as pl
from jax.experimental.pallas import tpu as pltpu


# ---------------------------------------------------------------------------
# Config (matches FeatureGoalWeightUSF.default_config) + padded sizes
# ---------------------------------------------------------------------------
STATE_SIZE = 2
GOAL_SIZE = 2
FEATURES_SIZE = 100
NUM_ACTIONS = 4
HID1 = 64          # policy_goal_layer hidden
HID2 = 256         # concatenation_layer hidden

FPAD = 128         # features_size padded to full lane width
H1PAD = 128        # HID1 padded to full lane width
QOUT = 8           # q output columns (4 useful, 8 stored -> narrow masked store)
MAX_BATCH_BLOCK = 512


def _round_up(x, m):
    return (x + m - 1) // m * m


# ---------------------------------------------------------------------------
# Kernel
# ---------------------------------------------------------------------------
def usf_kernel(feat_ref, goal_ref, wenv_ref,
               w1_ref, b1_ref, w3t_ref, w23_ref, b3_ref,
               w4_ref, b4_ref, sel_ref,
               q_ref, sf_ref):
    feat = feat_ref[...]                       # (BB, FPAD)
    goal = goal_ref[...]                       # (BB, GOAL_SIZE)
    wenv = wenv_ref[...]                       # (BB, FPAD), padded lanes are 0

    # --- policy_goal_layer hidden -------------------------------------------
    # K=2 matmul replaced by broadcast FMAs on the VPU (a K=2 MXU matmul uses
    # 2/256 of the systolic array and still pays full push/pop latency).
    w1 = w1_ref[...]                           # (GOAL_SIZE, H1PAD)
    h1 = goal[:, 0:1] * w1[0:1, :]
    for g in range(1, GOAL_SIZE):              # static unroll (GOAL_SIZE == 2)
        h1 = h1 + goal[:, g:g + 1] * w1[g:g + 1, :]
    h1 = jnp.maximum(h1 + b1_ref[...], 0.0)    # (BB, H1PAD), padded lanes 0

    # --- concatenation_layer (W2 folded into W3, concat fused away) ----------
    # h2 = ReLU(feat @ W3_top + h1 @ (W2 @ W3_bot) + (b3 + b2 @ W3_bot))
    h2 = (jnp.dot(feat, w3t_ref[...], preferred_element_type=jnp.float32)
          + jnp.dot(h1, w23_ref[...], preferred_element_type=jnp.float32)
          + b3_ref[...])
    h2 = jnp.maximum(h2, 0.0)                  # (BB, HID2)

    sf_flat = (jnp.dot(h2, w4_ref[...], preferred_element_type=jnp.float32)
               + b4_ref[...])                  # (BB, A*FPAD), lane-dense
    sf_ref[...] = sf_flat                      # unmasked vst (multiple of 128 lanes)

    # --- q values -------------------------------------------------------------
    # q[b, a] = sum_f sf[b, a, f] * w_env[b, f]
    # wenv is replicated across the 4 action lane-blocks with VPU copies
    # (no wrapper-side tiling / extra HBM stream), then one VPU multiply and
    # one tiny MXU matmul against a static 0/1 block-selection matrix.
    wenv_rep = jnp.concatenate([wenv] * NUM_ACTIONS, axis=1)   # (BB, A*FPAD)
    prod = sf_flat * wenv_rep                                   # VPU
    q_ref[...] = jnp.dot(prod, sel_ref[...],
                         preferred_element_type=jnp.float32)    # (BB, QOUT)


# ---------------------------------------------------------------------------
# Wrapper
# ---------------------------------------------------------------------------
def feature_goal_weight_usf(features, policy_goal_position, env_goal_weights,
                            padded_params, *, return_padded_sf=False):
    """Fused forward pass; returns (q, sf, env_goal_weights, features)."""
    B = features.shape[0]
    Bp8 = _round_up(B, 8)
    BB = min(Bp8, MAX_BATCH_BLOCK)
    # Keep >= 2 batch blocks for large batches so v7x's 2 TensorCores both
    # get work (dimension_semantics=("parallel",) shards the batch grid).
    if BB >= 256 and Bp8 <= BB:
        BB = _round_up(BB // 2, 8)
    Bp = _round_up(B, BB)
    nb = Bp // BB

    def pad2(x, rows, cols):
        return jnp.pad(x, ((0, rows - x.shape[0]), (0, cols - x.shape[1])))

    feat_p = pad2(features, Bp, FPAD)
    goal_p = pad2(policy_goal_position, Bp, GOAL_SIZE)
    wenv_p = pad2(env_goal_weights, Bp, FPAD)          # padded lanes are 0

    p = padded_params

    def batch_spec(cols):
        return pl.BlockSpec((BB, cols), lambda i: (i, 0))

    def weight_spec(arr):
        # full-array block, constant block index -> DMA'd once, VMEM-resident
        return pl.BlockSpec(arr.shape, lambda i: (0, 0))

    in_specs = [
        batch_spec(FPAD),                       # features
        batch_spec(GOAL_SIZE),                  # policy goal position
        batch_spec(FPAD),                       # env goal weights (NOT tiled)
        weight_spec(p["w1"]), weight_spec(p["b1"]),
        weight_spec(p["w3t"]), weight_spec(p["w23"]), weight_spec(p["b3"]),
        weight_spec(p["w4"]), weight_spec(p["b4"]),
        weight_spec(p["sel"]),
    ]
    out_specs = (batch_spec(QOUT), batch_spec(NUM_ACTIONS * FPAD))

    q_pad, sf_pad = pl.pallas_call(
        usf_kernel,
        out_shape=(
            jax.ShapeDtypeStruct((Bp, QOUT), jnp.float32),
            jax.ShapeDtypeStruct((Bp, NUM_ACTIONS * FPAD), jnp.float32),
        ),
        grid_spec=pltpu.PrefetchScalarGridSpec(
            num_scalar_prefetch=0,
            grid=(nb,),
            in_specs=in_specs,
            out_specs=out_specs,
        ),
        compiler_params=pltpu.CompilerParams(
            dimension_semantics=("parallel",),
            vmem_limit_bytes=32 * 1024 * 1024),
    )(feat_p, goal_p, wenv_p,
      p["w1"], p["b1"], p["w3t"], p["w23"], p["b3"],
      p["w4"], p["b4"], p["sel"])

    q = q_pad[:B, :NUM_ACTIONS]
    if return_padded_sf:
        # Lane-padded layout (B, A, FPAD); columns [FEATURES_SIZE:] are zero.
        # Avoids a full non-contiguous HBM re-copy of sf outside the kernel.
        sf = sf_pad[:B].reshape(B, NUM_ACTIONS, FPAD)
    else:
        sf = sf_pad[:B].reshape(B, NUM_ACTIONS, FPAD)[:, :, :FEATURES_SIZE]
    return q, sf, env_goal_weights, features


# ---------------------------------------------------------------------------
# Parameter construction / one-time padding
# ---------------------------------------------------------------------------
def init_params(key):
    """Deterministic synthetic parameters in PyTorch (in, out) layout, unpadded."""
    ks = jax.random.split(key, 8)

    def lin(kw, kb, fan_in, fan_out):
        bound = 1.0 / jnp.sqrt(fan_in)
        w = jax.random.uniform(kw, (fan_in, fan_out), jnp.float32, -bound, bound)
        b = jax.random.uniform(kb, (1, fan_out), jnp.float32, -bound, bound)
        return w, b

    w1, b1 = lin(ks[0], ks[1], GOAL_SIZE, HID1)
    w2, b2 = lin(ks[2], ks[3], HID1, FEATURES_SIZE)
    w3, b3 = lin(ks[4], ks[5], 2 * FEATURES_SIZE, HID2)
    w4, b4 = lin(ks[6], ks[7], HID2, NUM_ACTIONS * FEATURES_SIZE)
    return {"w1": w1, "b1": b1, "w2": w2, "b2": b2,
            "w3": w3, "b3": b3, "w4": w4, "b4": b4}


def prepare_params(p):
    """One-time zero-padding / folding of weights (hoisted out of the kernel)."""
    w1 = jnp.pad(p["w1"], ((0, 0), (0, H1PAD - HID1)))                  # (2, 128)
    b1 = jnp.pad(p["b1"], ((0, 0), (0, H1PAD - HID1)))                  # (1, 128)

    # Split W3 into the half that multiplies `features` and the half that
    # multiplies gpf.  Since gpf = h1 @ W2 + b2 has no activation, fold W2/b2
    # into the bottom half:
    #   feat @ W3_top + (h1 @ W2 + b2) @ W3_bot + b3
    #     = feat @ W3_top + h1 @ (W2 @ W3_bot) + (b3 + b2 @ W3_bot)
    w3_top = p["w3"][:FEATURES_SIZE]                                    # (100, 256)
    w3_bot = p["w3"][FEATURES_SIZE:]                                    # (100, 256)
    w3t = jnp.pad(w3_top, ((0, FPAD - FEATURES_SIZE), (0, 0)))          # (128, 256)
    w23 = jnp.pad(p["w2"] @ w3_bot, ((0, H1PAD - HID1), (0, 0)))        # (128, 256)
    b3 = p["b3"] + p["b2"] @ w3_bot                                     # (1, 256)

    # Per-action column blocks of w4 / b4 padded from F=100 to FPAD=128 lanes.
    w4 = jnp.zeros((HID2, NUM_ACTIONS * FPAD), jnp.float32)
    b4 = jnp.zeros((1, NUM_ACTIONS * FPAD), jnp.float32)
    for a in range(NUM_ACTIONS):
        src = slice(a * FEATURES_SIZE, (a + 1) * FEATURES_SIZE)
        dst = slice(a * FPAD, a * FPAD + FEATURES_SIZE)
        w4 = w4.at[:, dst].set(p["w4"][:, src])
        b4 = b4.at[:, dst].set(p["b4"][:, src])

    # Static 0/1 block-selection matrix: q = (sf * wenv_rep) @ sel, shape (512, 8).
    action_of_lane = jnp.arange(NUM_ACTIONS * FPAD) // FPAD
    sel = (action_of_lane[:, None] == jnp.arange(QOUT)[None, :]).astype(jnp.float32)

    return {"w1": w1, "b1": b1, "w3t": w3t, "w23": w23, "b3": b3,
            "w4": w4, "b4": b4, "sel": sel}


# ---------------------------------------------------------------------------
# Pure-JAX reference (mirrors the PyTorch module exactly)
# ---------------------------------------------------------------------------
def reference_forward(features, goal, w_env, p):
    h1 = jnp.maximum(goal @ p["w1"] + p["b1"], 0.0)
    gpf = h1 @ p["w2"] + p["b2"]
    joined = jnp.concatenate([features, gpf], axis=1)
    h2 = jnp.maximum(joined @ p["w3"] + p["b3"], 0.0)
    sf = (h2 @ p["w4"] + p["b4"]).reshape(features.shape[0], NUM_ACTIONS,
                                          FEATURES_SIZE)
    q = jnp.sum(sf * w_env[:, None, :], axis=2)
    return q, sf


if __name__ == "__main__":
    key = jax.random.PRNGKey(0)
    k_feat, k_goal, k_w, k_param = jax.random.split(key, 4)

    B = 8
    features = jax.random.normal(k_feat, (B, FEATURES_SIZE), jnp.float32)
    policy_goal_position = jax.random.normal(k_goal, (B, GOAL_SIZE), jnp.float32)
    env_goal_weights = jax.random.normal(k_w, (B, FEATURES_SIZE), jnp.float32)

    params = init_params(k_param)
    padded_params = prepare_params(params)     # one-time padding/folding, hoisted

    q, sf, w_out, feat_out = feature_goal_weight_usf(
        features, policy_goal_position, env_goal_weights, padded_params)
    jax.block_until_ready((q, sf, w_out, feat_out))

    q_ref, sf_ref = reference_forward(features, policy_goal_position,
                                      env_goal_weights, params)
    assert q.shape == (B, NUM_ACTIONS)
    assert sf.shape == (B, NUM_ACTIONS, FEATURES_SIZE)
    assert jnp.allclose(q, q_ref, atol=1e-4, rtol=1e-4)
    assert jnp.allclose(sf, sf_ref, atol=1e-4, rtol=1e-4)
    assert jnp.array_equal(w_out, env_goal_weights)
    assert jnp.array_equal(feat_out, features)

    print("KERNEL_OK")
</pallas_src>

<mosaic_0001>
module attributes {stable_mosaic.version = 11 : i64} {
  func.func @usf_kernel(%arg0: i32, %arg1: memref<8x128xf32, #tpu.memory_space<vmem>>, %arg2: memref<8x2xf32, #tpu.memory_space<vmem>>, %arg3: memref<8x128xf32, #tpu.memory_space<vmem>>, %arg4: memref<2x128xf32, #tpu.memory_space<vmem>>, %arg5: memref<1x128xf32, #tpu.memory_space<vmem>>, %arg6: memref<128x256xf32, #tpu.memory_space<vmem>>, %arg7: memref<128x256xf32, #tpu.memory_space<vmem>>, %arg8: memref<1x256xf32, #tpu.memory_space<vmem>>, %arg9: memref<256x512xf32, #tpu.memory_space<vmem>>, %arg10: memref<1x512xf32, #tpu.memory_space<vmem>>, %arg11: memref<512x8xf32, #tpu.memory_space<vmem>>, %arg12: memref<8x8xf32, #tpu.memory_space<vmem>>, %arg13: memref<8x512xf32, #tpu.memory_space<vmem>>) attributes {dimension_semantics = [#tpu.dimension_semantics<parallel>], iteration_bounds = array<i64: 1>, scalar_prefetch = 0 : i64, scratch_operands = 0 : i64, tpu.core_type = #tpu.core_type<tc>, window_params = [{transform_indices = @transform_0, window_bounds = array<i64: 8, 128>}, {transform_indices = @transform_1, window_bounds = array<i64: 8, 2>}, {transform_indices = @transform_2, window_bounds = array<i64: 8, 128>}, {pipeline_mode = #tpu.pipeline_mode<synchronous>, transform_indices = @transform_3, window_bounds = array<i64: 2, 128>}, {pipeline_mode = #tpu.pipeline_mode<synchronous>, transform_indices = @transform_4, window_bounds = array<i64: 1, 128>}, {pipeline_mode = #tpu.pipeline_mode<synchronous>, transform_indices = @transform_5, window_bounds = array<i64: 128, 256>}, {pipeline_mode = #tpu.pipeline_mode<synchronous>, transform_indices = @transform_6, window_bounds = array<i64: 128, 256>}, {pipeline_mode = #tpu.pipeline_mode<synchronous>, transform_indices = @transform_7, window_bounds = array<i64: 1, 256>}, {pipeline_mode = #tpu.pipeline_mode<synchronous>, transform_indices = @transform_8, window_bounds = array<i64: 256, 512>}, {pipeline_mode = #tpu.pipeline_mode<synchronous>, transform_indices = @transform_9, window_bounds = array<i64: 1, 512>}, {pipeline_mode = #tpu.pipeline_mode<synchronous>, transform_indices = @transform_10, window_bounds = array<i64: 512, 8>}, {transform_indices = @transform_11, window_bounds = array<i64: 8, 8>}, {transform_indices = @transform_12, window_bounds = array<i64: 8, 512>}]} {
    %c0 = arith.constant 0 : index
    %c0_0 = arith.constant 0 : index
    %0 = vector.load %arg1[%c0, %c0_0] : memref<8x128xf32, #tpu.memory_space<vmem>>, vector<8x128xf32>
    %c0_1 = arith.constant 0 : index
    %c0_2 = arith.constant 0 : index
    %1 = vector.load %arg2[%c0_1, %c0_2] : memref<8x2xf32, #tpu.memory_space<vmem>>, vector<8x2xf32>
    %c0_3 = arith.constant 0 : index
    %c0_4 = arith.constant 0 : index
    %2 = vector.load %arg3[%c0_3, %c0_4] : memref<8x128xf32, #tpu.memory_space<vmem>>, vector<8x128xf32>
    %c0_5 = arith.constant 0 : index
    %c0_6 = arith.constant 0 : index
    %3 = vector.load %arg4[%c0_5, %c0_6] : memref<2x128xf32, #tpu.memory_space<vmem>>, vector<2x128xf32>
    %4 = vector.extract_strided_slice %1 {offsets = [0, 0], sizes = [8, 1], strides = [1, 1]} : vector<8x2xf32> to vector<8x1xf32>
    %5 = vector.extract_strided_slice %3 {offsets = [0, 0], sizes = [1, 128], strides = [1, 1]} : vector<2x128xf32> to vector<1x128xf32>
    %6 = vector.broadcast %4 : vector<8x1xf32> to vector<8x128xf32>
    %7 = vector.broadcast %5 : vector<1x128xf32> to vector<8x128xf32>
    %8 = arith.mulf %6, %7 : vector<8x128xf32>
    %9 = vector.extract_strided_slice %1 {offsets = [0, 1], sizes = [8, 1], strides = [1, 1]} : vector<8x2xf32> to vector<8x1xf32>
    %10 = vector.extract_strided_slice %3 {offsets = [1, 0], sizes = [1, 128], strides = [1, 1]} : vector<2x128xf32> to vector<1x128xf32>
    %11 = vector.broadcast %9 : vector<8x1xf32> to vector<8x128xf32>
    %12 = vector.broadcast %10 : vector<1x128xf32> to vector<8x128xf32>
    %13 = arith.mulf %11, %12 : vector<8x128xf32>
    %14 = arith.addf %8, %13 : vector<8x128xf32>
    %c0_7 = arith.constant 0 : index
    %c0_8 = arith.constant 0 : index
    %15 = vector.load %arg5[%c0_7, %c0_8] : memref<1x128xf32, #tpu.memory_space<vmem>>, vector<1x128xf32>
    %16 = vector.broadcast %15 : vector<1x128xf32> to vector<8x128xf32>
    %17 = arith.addf %14, %16 : vector<8x128xf32>
    %cst = arith.constant 0.000000e+00 : f32
    %18 = vector.broadcast %cst : f32 to vector<8x128xf32>
    %19 = arith.maximumf %17, %18 : vector<8x128xf32>
    %c0_9 = arith.constant 0 : index
    %c0_10 = arith.constant 0 : index
    %20 = vector.load %arg6[%c0_9, %c0_10] : memref<128x256xf32, #tpu.memory_space<vmem>>, vector<128x256xf32>
    %cst_11 = arith.constant dense<0.000000e+00> : vector<8x256xf32>
    %21 = tpu.matmul %0, %20, %cst_11 {dimension_numbers = #tpu.dot_dimension_numbers<[1], [0], [0], [1], [0, 0, 1, 1], [], []>} : vector<8x128xf32>, vector<128x256xf32>, vector<8x256xf32> -> vector<8x256xf32>
    %c0_12 = arith.constant 0 : index
    %c0_13 = arith.constant 0 : index
    %22 = vector.load %arg7[%c0_12, %c0_13] : memref<128x256xf32, #tpu.memory_space<vmem>>, vector<128x256xf32>
    %cst_14 = arith.constant dense<0.000000e+00> : vector<8x256xf32>
    %23 = tpu.matmul %19, %22, %cst_14 {dimension_numbers = #tpu.dot_dimension_numbers<[1], [0], [0], [1], [0, 0, 1, 1], [], []>} : vector<8x128xf32>, vector<128x256xf32>, vector<8x256xf32> -> vector<8x256xf32>
    %24 = arith.addf %21, %23 : vector<8x256xf32>
    %c0_15 = arith.constant 0 : index
    %c0_16 = arith.constant 0 : index
    %25 = vector.load %arg8[%c0_15, %c0_16] : memref<1x256xf32, #tpu.memory_space<vmem>>, vector<1x256xf32>
    %26 = vector.broadcast %25 : vector<1x256xf32> to vector<8x256xf32>
    %27 = arith.addf %24, %26 : vector<8x256xf32>
    %cst_17 = arith.constant 0.000000e+00 : f32
    %28 = vector.broadcast %cst_17 : f32 to vector<8x256xf32>
    %29 = arith.maximumf %27, %28 : vector<8x256xf32>
    %c0_18 = arith.constant 0 : index
    %c0_19 = arith.constant 0 : index
    %30 = vector.load %arg9[%c0_18, %c0_19] : memref<256x512xf32, #tpu.memory_space<vmem>>, vector<256x512xf32>
    %cst_20 = arith.constant dense<0.000000e+00> : vector<8x512xf32>
    %31 = tpu.matmul %29, %30, %cst_20 {dimension_numbers = #tpu.dot_dimension_numbers<[1], [0], [0], [1], [0, 0, 1, 1], [], []>} : vector<8x256xf32>, vector<256x512xf32>, vector<8x512xf32> -> vector<8x512xf32>
    %c0_21 = arith.constant 0 : index
    %c0_22 = arith.constant 0 : index
    %32 = vector.load %arg10[%c0_21, %c0_22] : memref<1x512xf32, #tpu.memory_space<vmem>>, vector<1x512xf32>
    %33 = vector.broadcast %32 : vector<1x512xf32> to vector<8x512xf32>
    %34 = arith.addf %31, %33 : vector<8x512xf32>
    %c0_23 = arith.constant 0 : index
    %c0_24 = arith.constant 0 : index
    %35 = vector.load %arg13[%c0_23, %c0_24] : memref<8x512xf32, #tpu.memory_space<vmem>>, vector<8x512xf32>
    tpu.vector_store %arg13[%c0_23, %c0_24], %34 {strides = array<i32>} : memref<8x512xf32, #tpu.memory_space<vmem>>, vector<8x512xf32>,
    %36 = tpu.concatenate %2, %2, %2, %2 in 1 : vector<8x128xf32>, vector<8x128xf32>, vector<8x128xf32>, vector<8x128xf32> -> vector<8x512xf32>
    %37 = arith.mulf %34, %36 : vector<8x512xf32>
    %c0_25 = arith.constant 0 : index
    %c0_26 = arith.constant 0 : index
    %38 = vector.load %arg11[%c0_25, %c0_26] : memref<512x8xf32, #tpu.memory_space<vmem>>, vector<512x8xf32>
    %cst_27 = arith.constant dense<0.000000e+00> : vector<8x8xf32>
    %39 = tpu.matmul %37, %38, %cst_27 {dimension_numbers = #tpu.dot_dimension_numbers<[1], [0], [0], [1], [0, 0, 1, 1], [], []>} : vector<8x512xf32>, vector<512x8xf32>, vector<8x8xf32> -> vector<8x8xf32>
    %c0_28 = arith.constant 0 : index
    %c0_29 = arith.constant 0 : index
    %40 = vector.load %arg12[%c0_28, %c0_29] : memref<8x8xf32, #tpu.memory_space<vmem>>, vector<8x8xf32>
    tpu.vector_store %arg12[%c0_28, %c0_29], %39 {strides = array<i32>} : memref<8x8xf32, #tpu.memory_space<vmem>>, vector<8x8xf32>,
    return
  }
  func.func @transform_0(%arg0: i32) -> (i32, i32) {
    %c0_i32 = arith.constant 0 : i32
    %c0_i32_0 = arith.constant 0 : i32
    return %arg0, %c0_i32 : i32, i32
  }
  func.func @transform_1(%arg0: i32) -> (i32, i32) {
    %c0_i32 = arith.constant 0 : i32
    %c0_i32_0 = arith.constant 0 : i32
    return %arg0, %c0_i32 : i32, i32
  }
  func.func @transform_2(%arg0: i32) -> (i32, i32) {
    %c0_i32 = arith.constant 0 : i32
    %c0_i32_0 = arith.constant 0 : i32
    return %arg0, %c0_i32 : i32, i32
  }
  func.func @transform_3(%arg0: i32) -> (i32, i32) {
    %c0_i32 = arith.constant 0 : i32
    %c0_i32_0 = arith.constant 0 : i32
    %c0_i32_1 = arith.constant 0 : i32
    return %c0_i32, %c0_i32_0 : i32, i32
  }
  func.func @transform_4(%arg0: i32) -> (i32, i32) {
    %c0_i32 = arith.constant 0 : i32
    %c0_i32_0 = arith.constant 0 : i32
    %c0_i32_1 = arith.constant 0 : i32
    return %c0_i32, %c0_i32_0 : i32, i32
  }
  func.func @transform_5(%arg0: i32) -> (i32, i32) {
    %c0_i32 = arith.constant 0 : i32
    %c0_i32_0 = arith.constant 0 : i32
    %c0_i32_1 = arith.constant 0 : i32
    return %c0_i32, %c0_i32_0 : i32, i32
  }
  func.func @transform_6(%arg0: i32) -> (i32, i32) {
    %c0_i32 = arith.constant 0 : i32
    %c0_i32_0 = arith.constant 0 : i32
    %c0_i32_1 = arith.constant 0 : i32
    return %c0_i32, %c0_i32_0 : i32, i32
  }
  func.func @transform_7(%arg0: i32) -> (i32, i32) {
    %c0_i32 = arith.constant 0 : i32
    %c0_i32_0 = arith.constant 0 : i32
    %c0_i32_1 = arith.constant 0 : i32
    return %c0_i32, %c0_i32_0 : i32, i32
  }
  func.func @transform_8(%arg0: i32) -> (i32, i32) {
    %c0_i32 = arith.constant 0 : i32
    %c0_i32_0 = arith.constant 0 : i32
    %c0_i32_1 = arith.constant 0 : i32
    return %c0_i32, %c0_i32_0 : i32, i32
  }
  func.func @transform_9(%arg0: i32) -> (i32, i32) {
    %c0_i32 = arith.constant 0 : i32
    %c0_i32_0 = arith.constant 0 : i32
    %c0_i32_1 = arith.constant 0 : i32
    return %c0_i32, %c0_i32_0 : i32, i32
  }
  func.func @transform_10(%arg0: i32) -> (i32, i32) {
    %c0_i32 = arith.constant 0 : i32
    %c0_i32_0 = arith.constant 0 : i32
    %c0_i32_1 = arith.constant 0 : i32
    return %c0_i32, %c0_i32_0 : i32, i32
  }
  func.func @transform_11(%arg0: i32) -> (i32, i32) {
    %c0_i32 = arith.constant 0 : i32
    %c0_i32_0 = arith.constant 0 : i32
    return %arg0, %c0_i32 : i32, i32
  }
  func.func @transform_12(%arg0: i32) -> (i32, i32) {
    %c0_i32 = arith.constant 0 : i32
    %c0_i32_0 = arith.constant 0 : i32
    return %arg0, %c0_i32 : i32, i32
  }
}

</mosaic_0001>

<bundles_post_ra>
// kernel: tpu_custom_call.1
= control target key start
LH: loop header
LB: loop body
LE: loop exit
PB: predicated region body
PF: predicated region fallthrough
CT: control target
= control target key end

     0   :  { %18 = vsyncpa [#allocation3], 0  ;;  %s1496_s0 = inlined_call_operand.vmem [shape: f32[8,128], index: 0, kind: input, shape index: {}]   ;;  %s1497_s1 = inlined_call_operand.vmem [shape: f32[8,2], index: 1, kind: input, shape index: {}]   ;;  %s1498_s2 = inlined_call_operand.vmem [shape: f32[8,128], index: 2, kind: input, shape index: {}]   ;;  %s1499_s3 = inlined_call_operand.vmem [shape: f32[2,128], index: 3, kind: input, shape index: {}]   ;;  %s1500_s4 = inlined_call_operand.vmem [shape: f32[1,128], index: 4, kind: input, shape index: {}]   ;;  %s1501_s5 = inlined_call_operand.vmem [shape: f32[128,256], index: 5, kind: input, shape index: {}]   ;;  %s1502_s6 = inlined_call_operand.vmem [shape: f32[128,256], index: 6, kind: input, shape index: {}]   ;;  %s1503_s7 = inlined_call_operand.vmem [shape: f32[1,256], index: 7, kind: input, shape index: {}]   ;;  %s1504_s8 = inlined_call_operand.hbm [shape: f32[256,512], index: 8, kind: input, shape index: {}]   ;;  %s1505_s9 = inlined_call_operand.vmem [shape: f32[1,512], index: 9, kind: input, shape index: {}]   ;;  %s1506_s10 = inlined_call_operand.vmem [shape: f32[512,8], index: 10, kind: input, shape index: {}]   ;;  %s1507_s11 = inlined_call_operand.hbm [shape: f32[8,8], index: 11, kind: output, shape index: {0}]   ;;  %s1508_s12 = inlined_call_operand.hbm [shape: f32[8,512], index: 12, kind: output, shape index: {1}]  }
   0x1   :  { %19 = vsyncpa [#allocation4], 0 }
   0x2   :  { %20 = vsyncpa [#allocation7], 0  ;;  %s993_s21 = smov [#allocation2]  }
   0x3   :  { %s42_s22 = sshll.u32 %s993_s21, 4  ;;  %s43_s22 = int_to_ptr.vmem [resolvable:$true] %s42_s22 }
   0x4   :  { %s935_s23 = scalar_lea.vmem %s43_s22, 16384  ;;  %p940_p1 = scmp.lt.s32.totalorder %s43_s22, %s43_s22 }
   0x5   :  { %p936_p0 = scmp.ne.s32.totalorder %s43_s22, %s935_s23  ;;  %p941_p2 = scmp.lt.s32.totalorder %s935_s23, %s935_s23 }
   0x7   :  { %p942_p3 = por %p941_p2, %p940_p1 }
   0x9   :  { %p943_p4 = pnand %p942_p3, %p936_p0 }
   0xb   :  { %946 = shalt.err (!%p943_p4)
}
   0xc   :  { %s994_s24 = smov 512   ;;  %s995_s25 = smov 32  }
   0xd   :  { %48 = dma.hbm_to_vmem [thread:$0]  %s1504_s8, 16384, %s43_s22, [#allocation3], %s994_s24, %s994_s24, %s995_s25  }
   0xe   :  { %987 = dma.done.wait [#allocation3], 16384  }
   0xf   :  { %988 = vsyncadd [#allocation3], 4294950912  ;;  %v996_v0 = vmov 0   ;;  %v57_v1 = vld [vmem:[%s1497_s1] sm:$0xff]  ;;  %v120_v2 = vld [vmem:[%s1501_s5 + $0xf8] sm:$0xff]  ;;  %v997_v13 = vmov 1  }
  0x10   :  { %925 = vset.pattern.permute.xlu0 %v996_v0  ;;  %v119_v3 = vld [vmem:[%s1501_s5 + $0xf0] sm:$0xff]  ;;  %224 = vmatprep.subr.mxu1 %v120_v2  ;;  %v152_v4 = vld [vmem:[%s1502_s6 + $0xf8] sm:$0xff]  ;;  %v118_v5 = vld [vmem:[%s1501_s5 + $0xe8] sm:$0xff] }
  0x11   :  { %62 = vperm.xlu0 %925, %v57_v1   ;;  %v151_v6 = vld [vmem:[%s1502_s6 + $0xf0] sm:$0xff]  ;;  %225 = vmatpush1.msra.mxu1 %v119_v3  ;;  %v117_v7 = vld [vmem:[%s1501_s5 + $0xe0] sm:$0xff]  ;;  %v150_v8 = vld [vmem:[%s1502_s6 + $0xe8] sm:$0xff] }
  0x12   :  { %153 = vmatprep.subr.mxu0 %v152_v4  ;;  %v116_v9 = vld [vmem:[%s1501_s5 + $0xd8] sm:$0xff]  ;;  %226 = vmatprep.subr.mxu1 %v118_v5  ;;  %v149_v10 = vld [vmem:[%s1502_s6 + $0xe0] sm:$0xff]  ;;  %v115_v11 = vld [vmem:[%s1501_s5 + $0xd0] sm:$0xff]  ;;  %v998_v4 = vmov 0.0  }
  0x13   :  { %154 = vmatpush1.msra.mxu0 %v151_v6  ;;  %227 = vmatpush1.msra.mxu1 %v117_v7  ;;  %v148_v12 = vld [vmem:[%s1502_s6 + $0xd8] sm:$0xff]  ;;  %v114_v14 = vld [vmem:[%s1501_s5 + $0xc8] sm:$0xff]  ;;  %v147_v15 = vld [vmem:[%s1502_s6 + $0xd0] sm:$0xff] }
  0x14   :  { %155 = vmatprep.subr.mxu0 %v150_v8  ;;  %228 = vmatprep.subr.mxu1 %v116_v9  ;;  %v113_v16 = vld [vmem:[%s1501_s5 + $0xc0] sm:$0xff]  ;;  %v146_v17 = vld [vmem:[%s1502_s6 + $0xc8] sm:$0xff]  ;;  %v112_v18 = vld [vmem:[%s1501_s5 + $0xb8] sm:$0xff] }
  0x15   :  { %926 = vset.pattern.permute.xlu0 %v997_v13  ;;  %156 = vmatpush1.msra.mxu0 %v149_v10  ;;  %v145_v19 = vld [vmem:[%s1502_s6 + $0xc0] sm:$0xff]  ;;  %v111_v20 = vld [vmem:[%s1501_s5 + $0xb0] sm:$0xff]  ;;  %v144_v21 = vld [vmem:[%s1502_s6 + $0xb8] sm:$0xff] }
  0x16   :  { %71 = vperm.xlu0 %926, %v57_v1   ;;  %229 = vmatpush1.msra.mxu1 %v115_v11  ;;  %v110_v22 = vld [vmem:[%s1501_s5 + $0xa8] sm:$0xff]  ;;  %v143_v23 = vld [vmem:[%s1502_s6 + $0xb0] sm:$0xff]  ;;  %v109_v24 = vld [vmem:[%s1501_s5 + $0xa0] sm:$0xff] }
  0x17   :  { %157 = vmatprep.subr.mxu0 %v148_v12  ;;  %230 = vmatprep.subr.mxu1 %v114_v14  ;;  %v142_v25 = vld [vmem:[%s1502_s6 + $0xa8] sm:$0xff]  ;;  %v108_v26 = vld [vmem:[%s1501_s5 + $0x98] sm:$0xff]  ;;  %v141_v27 = vld [vmem:[%s1502_s6 + $0xa0] sm:$0xff] }
  0x18   :  { %158 = vmatpush1.msra.mxu0 %v147_v15  ;;  %231 = vmatpush1.msra.mxu1 %v113_v16  ;;  %v107_v28 = vld [vmem:[%s1501_s5 + $0x90] sm:$0xff]  ;;  %v140_v29 = vld [vmem:[%s1502_s6 + $0x98] sm:$0xff]  ;;  %v106_v30 = vld [vmem:[%s1501_s5 + $0x88] sm:$0xff] }
  0x19   :  { %159 = vmatprep.subr.mxu0 %v146_v17  ;;  %232 = vmatprep.subr.mxu1 %v112_v18  ;;  %v139_v31 = vld [vmem:[%s1502_s6 + $0x90] sm:$0xff]  ;;  %v105_v32 = vld [vmem:[%s1501_s5 + $0x80] sm:$0xff]  ;;  %v138_v33 = vld [vmem:[%s1502_s6 + $0x88] sm:$0xff] }
  0x1a   :  { %160 = vmatpush1.msra.mxu0 %v145_v19  ;;  %233 = vmatpush1.msra.mxu1 %v111_v20  ;;  %v104_v34 = vld [vmem:[%s1501_s5 + $0x78] sm:$0xff]  ;;  %v137_v35 = vld [vmem:[%s1502_s6 + $0x80] sm:$0xff]  ;;  %v103_v36 = vld [vmem:[%s1501_s5 + $0x70] sm:$0xff] }
  0x1b   :  { %161 = vmatprep.subr.mxu0 %v144_v21  ;;  %234 = vmatprep.subr.mxu1 %v110_v22  ;;  %v136_v37 = vld [vmem:[%s1502_s6 + $0x78] sm:$0xff]  ;;  %v102_v38 = vld [vmem:[%s1501_s5 + $0x68] sm:$0xff]  ;;  %v135_v39 = vld [vmem:[%s1502_s6 + $0x70] sm:$0xff] }
  0x1c   :  { %162 = vmatpush1.msra.mxu0 %v143_v23  ;;  %235 = vmatpush1.msra.mxu1 %v109_v24  ;;  %v101_v40 = vld [vmem:[%s1501_s5 + $0x60] sm:$0xff]  ;;  %v134_v41 = vld [vmem:[%s1502_s6 + $0x68] sm:$0xff]  ;;  %v100_v42 = vld [vmem:[%s1501_s5 + $0x58] sm:$0xff] }
  0x1d   :  { %163 = vmatprep.subr.mxu0 %v142_v25  ;;  %236 = vmatprep.subr.mxu1 %v108_v26  ;;  %v133_v43 = vld [vmem:[%s1502_s6 + $0x60] sm:$0xff]  ;;  %v99_v44 = vld [vmem:[%s1501_s5 + $0x50] sm:$0xff]  ;;  %v132_v45 = vld [vmem:[%s1502_s6 + $0x58] sm:$0xff] }
  0x1e   :  { %164 = vmatpush1.msra.mxu0 %v141_v27  ;;  %237 = vmatpush1.msra.mxu1 %v107_v28  ;;  %v98_v46 = vld [vmem:[%s1501_s5 + $0x48] sm:$0xff]  ;;  %v131_v47 = vld [vmem:[%s1502_s6 + $0x50] sm:$0xff]  ;;  %v97_v48 = vld [vmem:[%s1501_s5 + $0x40] sm:$0xff] }
  0x1f   :  { %165 = vmatprep.subr.mxu0 %v140_v29  ;;  %238 = vmatprep.subr.mxu1 %v106_v30  ;;  %v130_v49 = vld [vmem:[%s1502_s6 + $0x48] sm:$0xff]  ;;  %v96_v50 = vld [vmem:[%s1501_s5 + $0x38] sm:$0xff]  ;;  %v129_v51 = vld [vmem:[%s1502_s6 + $0x40] sm:$0xff] }
  0x20   :  { %166 = vmatpush1.msra.mxu0 %v139_v31  ;;  %239 = vmatpush1.msra.mxu1 %v105_v32  ;;  %v95_v52 = vld [vmem:[%s1501_s5 + $0x30] sm:$0xff]  ;;  %v128_v53 = vld [vmem:[%s1502_s6 + $0x38] sm:$0xff]  ;;  %v94_v54 = vld [vmem:[%s1501_s5 + $0x28] sm:$0xff] }
  0x21   :  { %167 = vmatprep.subr.mxu0 %v138_v33  ;;  %240 = vmatprep.subr.mxu1 %v104_v34  ;;  %v127_v55 = vld [vmem:[%s1502_s6 + $0x30] sm:$0xff]  ;;  %v93_v56 = vld [vmem:[%s1501_s5 + $0x20] sm:$0xff]  ;;  %v126_v57 = vld [vmem:[%s1502_s6 + $0x28] sm:$0xff] }
  0x22   :  { %168 = vmatpush1.msra.mxu0 %v137_v35  ;;  %241 = vmatpush1.msra.mxu1 %v103_v36  ;;  %v92_v58 = vld [vmem:[%s1501_s5 + $0x18] sm:$0xff]  ;;  %v125_v59 = vld [vmem:[%s1502_s6 + $0x20] sm:$0xff]  ;;  %v91_v60 = vld [vmem:[%s1501_s5 + $0x10] sm:$0xff] }
  0x23   :  { %169 = vmatprep.subr.mxu0 %v136_v37  ;;  %242 = vmatprep.subr.mxu1 %v102_v38  ;;  %v124_v61 = vld [vmem:[%s1502_s6 + $0x18] sm:$0xff]  ;;  %v90_v62 = vld [vmem:[%s1501_s5 + $0x8] sm:$0xff]  ;;  %v123_v63 = vld [vmem:[%s1502_s6 + $0x10] sm:$0xff] }
  0x24   :  { %170 = vmatpush1.msra.mxu0 %v135_v39  ;;  %243 = vmatpush1.msra.mxu1 %v101_v40  ;;  %v89_v0 = vld [vmem:[%s1501_s5] sm:$0xff]  ;;  %v122_v1 = vld [vmem:[%s1502_s6 + $0x8] sm:$0xff]  ;;  %v374_v6 = vld [vmem:[#allocation2 + $0x1f8] sm:$0xff] }
  0x25   :  { %171 = vmatprep.subr.mxu0 %v134_v41  ;;  %244 = vmatprep.subr.mxu1 %v100_v42  ;;  %v56_v2 = vld [vmem:[%s1496_s0] sm:$0xff]  ;;  %v372_v5 = vld [vmem:[#allocation2 + $0x1e8] sm:$0xff]  ;;  %v373_v7 = vld [vmem:[#allocation2 + $0x1f0] sm:$0xff] }
  0x26   :  { %172 = vmatpush1.msra.mxu0 %v133_v43  ;;  %245 = vmatpush1.msra.mxu1 %v99_v44  ;;  %v121_v3 = vld [vmem:[%s1502_s6] sm:$0xff]  ;;  %v370_v8 = vld [vmem:[#allocation2 + $0x1d8] sm:$0xff]  ;;  %v369_v9 = vld [vmem:[#allocation2 + $0x1d0] sm:$0xff] }
  0x27   :  { %173 = vmatprep.subr.mxu0 %v132_v45  ;;  %246 = vmatprep.subr.mxu1 %v98_v46  ;;  %v366_v10 = vld [vmem:[#allocation2 + $0x1b8] sm:$0xff]  ;;  %v365_v11 = vld [vmem:[#allocation2 + $0x1b0] sm:$0xff] }
  0x28   :  { %174 = vmatpush1.msra.mxu0 %v131_v47  ;;  %247 = vmatpush1.msra.mxu1 %v97_v48  ;;  %v362_v12 = vld [vmem:[#allocation2 + $0x198] sm:$0xff]  ;;  %v361_v13 = vld [vmem:[#allocation2 + $0x190] sm:$0xff] }
  0x29   :  { %175 = vmatprep.subr.mxu0 %v130_v49  ;;  %248 = vmatprep.subr.mxu1 %v96_v50  ;;  %v358_v14 = vld [vmem:[#allocation2 + $0x178] sm:$0xff]  ;;  %v357_v15 = vld [vmem:[#allocation2 + $0x170] sm:$0xff] }
  0x2a   :  { %176 = vmatpush1.msra.mxu0 %v129_v51  ;;  %249 = vmatpush1.msra.mxu1 %v95_v52  ;;  %v354_v16 = vld [vmem:[#allocation2 + $0x158] sm:$0xff]  ;;  %v353_v17 = vld [vmem:[#allocation2 + $0x150] sm:$0xff] }
  0x2b   :  { %177 = vmatprep.subr.mxu0 %v128_v53  ;;  %250 = vmatprep.subr.mxu1 %v94_v54  ;;  %v350_v18 = vld [vmem:[#allocation2 + $0x138] sm:$0xff]  ;;  %v349_v19 = vld [vmem:[#allocation2 + $0x130] sm:$0xff] }
  0x2c   :  { %178 = vmatpush1.msra.mxu0 %v127_v55  ;;  %251 = vmatpush1.msra.mxu1 %v93_v56  ;;  %v346_v20 = vld [vmem:[#allocation2 + $0x118] sm:$0xff]  ;;  %v345_v21 = vld [vmem:[#allocation2 + $0x110] sm:$0xff] }
  0x2d   :  { %179 = vmatprep.subr.mxu0 %v126_v57  ;;  %252 = vmatprep.subr.mxu1 %v92_v58  ;;  %v342_v22 = vld [vmem:[#allocation2 + $0xf8] sm:$0xff]  ;;  %v341_v23 = vld [vmem:[#allocation2 + $0xf0] sm:$0xff] }
  0x2e   :  { %180 = vmatpush1.msra.mxu0 %v125_v59  ;;  %253 = vmatpush1.msra.mxu1 %v91_v60  ;;  %v338_v24 = vld [vmem:[#allocation2 + $0xd8] sm:$0xff]  ;;  %v337_v25 = vld [vmem:[#allocation2 + $0xd0] sm:$0xff]  ;;  %v65_v60 = vlaneseq }
  0x2f   :  { %181 = vmatprep.subr.mxu0 %v124_v61  ;;  %254 = vmatprep.subr.mxu1 %v90_v62  ;;  %v334_v26 = vld [vmem:[#allocation2 + $0xb8] sm:$0xff]  ;;  %v333_v27 = vld [vmem:[#allocation2 + $0xb0] sm:$0xff] }
  0x30   :  { %182 = vmatpush1.msra.mxu0 %v123_v63  ;;  %255 = vmatpush1.msra.mxu1 %v89_v0  ;;  %v330_v28 = vld [vmem:[#allocation2 + $0x98] sm:$0xff]  ;;  %v329_v29 = vld [vmem:[#allocation2 + $0x90] sm:$0xff]  ;;  %v1267_v61 = vshrl.u32 %v65_v60, 7  ;;  %v59_v0 = vld [vmem:[%s1499_s3] sm:$0x3] }
  0x31   :  { %288 = vmatprep.mubr.f32.mxu1 %v998_v4  ;;  %183 = vmatprep.subr.mxu0 %v122_v1  ;;  %v326_v30 = vld [vmem:[#allocation2 + $0x78] sm:$0xff]  ;;  %v325_v31 = vld [vmem:[#allocation2 + $0x70] sm:$0xff]  ;;  %v400_v60 = vld [vmem:[#allocation2 + $0x2c8] sm:$0xff] }
  0x32   :  { %289 = vmatmul.mubr.f32.vlgmr.msra.gmra.mxu1 %v56_v2  ;;  %184 = vmatpush1.msra.mxu0 %v121_v3  ;;  %v322_v32 = vld [vmem:[#allocation2 + $0x58] sm:$0xff]  ;;  %v321_v33 = vld [vmem:[#allocation2 + $0x50] sm:$0xff]  ;;  %v1270_v62 = vsub.s32 0, %v1267_v61  ;;  %v1273_v63 = vsub.s32 1, %v1267_v61 }
  0x33   :  { %217 = vmatprep.mubr.f32.mxu0 %v998_v4  ;;  %461 = vmatprep.subr.mxu0 %v372_v5  ;;  %v318_v34 = vld [vmem:[#allocation2 + $0x38] sm:$0xff]  ;;  %v317_v35 = vld [vmem:[#allocation2 + $0x30] sm:$0xff] }
  0x34   :  { %532 = vmatprep.subr.mxu1 %v374_v6  ;;  %v314_v36 = vld [vmem:[#allocation2 + $0x18] sm:$0xff]  ;;  %v313_v37 = vld [vmem:[#allocation2 + $0x10] sm:$0xff]  ;;  %v68_v2 = vrot.slane %v59_v0, %v1270_v62  ;;  %v77_v3 = vrot.slane %v59_v0, %v1273_v63  ;;  %v399_v0 = vld [vmem:[#allocation2 + $0x2c0] sm:$0xff] }
  0x35   :  { %533 = vmatpush1.msra.mxu1 %v373_v7  ;;  %v438_v38 = vld [vmem:[#allocation2 + $0x3f8] sm:$0xff]  ;;  %v437_v39 = vld [vmem:[#allocation2 + $0x3f0] sm:$0xff]  ;;  %v846_v7 = vld [vmem:[%s1500_s4] ss:$0 sm:$0xff] }
  0x36   :  { %534 = vmatprep.subr.mxu1 %v370_v8  ;;  %v434_v40 = vld [vmem:[#allocation2 + $0x3d8] sm:$0xff]  ;;  %v433_v41 = vld [vmem:[#allocation2 + $0x3d0] sm:$0xff] }
  0x37   :  { %535 = vmatpush1.msra.mxu1 %v369_v9  ;;  %v430_v42 = vld [vmem:[#allocation2 + $0x3b8] sm:$0xff]  ;;  %v429_v43 = vld [vmem:[#allocation2 + $0x3b0] sm:$0xff] }
  0x38   :  { %536 = vmatprep.subr.mxu1 %v366_v10  ;;  %v426_v44 = vld [vmem:[#allocation2 + $0x398] sm:$0xff]  ;;  %v425_v45 = vld [vmem:[#allocation2 + $0x390] sm:$0xff] }
  0x39   :  { %537 = vmatpush1.msra.mxu1 %v365_v11  ;;  %v422_v46 = vld [vmem:[#allocation2 + $0x378] sm:$0xff]  ;;  %v421_v47 = vld [vmem:[#allocation2 + $0x370] sm:$0xff]  ;;  %v371_v11 = vld [vmem:[#allocation2 + $0x1e0] sm:$0xff] }
  0x3a   :  { %538 = vmatprep.subr.mxu1 %v362_v12  ;;  %v418_v48 = vld [vmem:[#allocation2 + $0x358] sm:$0xff]  ;;  %v417_v49 = vld [vmem:[#allocation2 + $0x350] sm:$0xff]  ;;  %v368_v12 = vld [vmem:[#allocation2 + $0x1c8] sm:$0xff] }
  0x3b   :  { %539 = vmatpush1.msra.mxu1 %v361_v13  ;;  %v414_v50 = vld [vmem:[#allocation2 + $0x338] sm:$0xff]  ;;  %v413_v51 = vld [vmem:[#allocation2 + $0x330] sm:$0xff]  ;;  %v367_v13 = vld [vmem:[#allocation2 + $0x1c0] sm:$0xff] }
  0x3c   :  { %540 = vmatprep.subr.mxu1 %v358_v14  ;;  %v410_v52 = vld [vmem:[#allocation2 + $0x318] sm:$0xff]  ;;  %v409_v53 = vld [vmem:[#allocation2 + $0x310] sm:$0xff]  ;;  %v364_v14 = vld [vmem:[#allocation2 + $0x1a8] sm:$0xff] }
  0x3d   :  { %541 = vmatpush1.msra.mxu1 %v357_v15  ;;  %v406_v54 = vld [vmem:[#allocation2 + $0x2f8] sm:$0xff]  ;;  %v405_v55 = vld [vmem:[#allocation2 + $0x2f0] sm:$0xff]  ;;  %v363_v15 = vld [vmem:[#allocation2 + $0x1a0] sm:$0xff] }
  0x3e   :  { %542 = vmatprep.subr.mxu1 %v354_v16  ;;  %v402_v56 = vld [vmem:[#allocation2 + $0x2d8] sm:$0xff]  ;;  %v401_v57 = vld [vmem:[#allocation2 + $0x2d0] sm:$0xff]  ;;  %v360_v16 = vld [vmem:[#allocation2 + $0x188] sm:$0xff] }
  0x3f   :  { %543 = vmatpush1.msra.mxu1 %v353_v17  ;;  %v398_v58 = vld [vmem:[#allocation2 + $0x2b8] sm:$0xff]  ;;  %v397_v59 = vld [vmem:[#allocation2 + $0x2b0] sm:$0xff]  ;;  %v359_v17 = vld [vmem:[#allocation2 + $0x180] sm:$0xff] }
  0x40   :  { %544 = vmatprep.subr.mxu1 %v350_v18  ;;  %v356_v18 = vld [vmem:[#allocation2 + $0x168] sm:$0xff] }
  0x41   :  { %545 = vmatpush1.msra.mxu1 %v349_v19  ;;  %v355_v19 = vld [vmem:[#allocation2 + $0x160] sm:$0xff] }
  0x42   :  { %546 = vmatprep.subr.mxu1 %v346_v20  ;;  %v352_v20 = vld [vmem:[#allocation2 + $0x148] sm:$0xff] }
  0x43   :  { %547 = vmatpush1.msra.mxu1 %v345_v21  ;;  %v351_v21 = vld [vmem:[#allocation2 + $0x140] sm:$0xff] }
  0x44   :  { %548 = vmatprep.subr.mxu1 %v342_v22  ;;  %v348_v22 = vld [vmem:[#allocation2 + $0x128] sm:$0xff] }
  0x45   :  { %549 = vmatpush1.msra.mxu1 %v341_v23  ;;  %v347_v23 = vld [vmem:[#allocation2 + $0x120] sm:$0xff] }
  0x46   :  { %550 = vmatprep.subr.mxu1 %v338_v24  ;;  %v344_v24 = vld [vmem:[#allocation2 + $0x108] sm:$0xff] }
  0x47   :  { %551 = vmatpush1.msra.mxu1 %v337_v25  ;;  %v343_v25 = vld [vmem:[#allocation2 + $0x100] sm:$0xff] }
  0x48   :  { %552 = vmatprep.subr.mxu1 %v334_v26  ;;  %v340_v26 = vld [vmem:[#allocation2 + $0xe8] sm:$0xff] }
  0x49   :  { %553 = vmatpush1.msra.mxu1 %v333_v27  ;;  %v339_v27 = vld [vmem:[#allocation2 + $0xe0] sm:$0xff] }
  0x4a   :  { %554 = vmatprep.subr.mxu1 %v330_v28  ;;  %v336_v28 = vld [vmem:[#allocation2 + $0xc8] sm:$0xff] }
  0x4b   :  { %555 = vmatpush1.msra.mxu1 %v329_v29  ;;  %v335_v29 = vld [vmem:[#allocation2 + $0xc0] sm:$0xff] }
  0x4c   :  { %556 = vmatprep.subr.mxu1 %v326_v30  ;;  %v332_v30 = vld [vmem:[#allocation2 + $0xa8] sm:$0xff] }
  0x4d   :  { %557 = vmatpush1.msra.mxu1 %v325_v31  ;;  %v331_v31 = vld [vmem:[#allocation2 + $0xa0] sm:$0xff] }
  0x4e   :  { %558 = vmatprep.subr.mxu1 %v322_v32  ;;  %v328_v32 = vld [vmem:[#allocation2 + $0x88] sm:$0xff] }
  0x4f   :  { %559 = vmatpush1.msra.mxu1 %v321_v33  ;;  %v327_v33 = vld [vmem:[#allocation2 + $0x80] sm:$0xff] }
  0x50   :  { %560 = vmatprep.subr.mxu1 %v318_v34  ;;  %v324_v34 = vld [vmem:[#allocation2 + $0x68] sm:$0xff] }
  0x51   :  { %561 = vmatpush1.msra.mxu1 %v317_v35  ;;  %v323_v35 = vld [vmem:[#allocation2 + $0x60] sm:$0xff] }
  0x52   :  { %562 = vmatprep.subr.mxu1 %v314_v36  ;;  %v320_v36 = vld [vmem:[#allocation2 + $0x48] sm:$0xff] }
  0x53   :  { %563 = vmatpush1.msra.mxu1 %v313_v37  ;;  %v319_v37 = vld [vmem:[#allocation2 + $0x40] sm:$0xff] }
  0x54   :  { %564 = vmatprep.subr.mxu1 %v438_v38  ;;  %v316_v38 = vld [vmem:[#allocation2 + $0x28] sm:$0xff] }
  0x55   :  { %565 = vmatpush2.msra.mxu1 %v437_v39  ;;  %v315_v39 = vld [vmem:[#allocation2 + $0x20] sm:$0xff] }
  0x56   :  { %566 = vmatprep.subr.mxu1 %v434_v40  ;;  %v312_v40 = vld [vmem:[#allocation2 + $0x8] sm:$0xff] }
  0x57   :  { %567 = vmatpush2.msra.mxu1 %v433_v41  ;;  %v311_v41 = vld [vmem:[#allocation2] sm:$0xff] }
  0x58   :  { %568 = vmatprep.subr.mxu1 %v430_v42  ;;  %v436_v42 = vld [vmem:[#allocation2 + $0x3e8] sm:$0xff] }
  0x59   :  { %569 = vmatpush2.msra.mxu1 %v429_v43  ;;  %v435_v43 = vld [vmem:[#allocation2 + $0x3e0] sm:$0xff] }
  0x5a   :  { %570 = vmatprep.subr.mxu1 %v426_v44  ;;  %v432_v44 = vld [vmem:[#allocation2 + $0x3c8] sm:$0xff] }
  0x5b   :  { %571 = vmatpush2.msra.mxu1 %v425_v45  ;;  %v431_v45 = vld [vmem:[#allocation2 + $0x3c0] sm:$0xff] }
  0x5c   :  { %572 = vmatprep.subr.mxu1 %v422_v46  ;;  %v428_v46 = vld [vmem:[#allocation2 + $0x3a8] sm:$0xff] }
  0x5d   :  { %573 = vmatpush2.msra.mxu1 %v421_v47  ;;  %v427_v47 = vld [vmem:[#allocation2 + $0x3a0] sm:$0xff] }
  0x5e   :  { %574 = vmatprep.subr.mxu1 %v418_v48  ;;  %v424_v48 = vld [vmem:[#allocation2 + $0x388] sm:$0xff] }
  0x5f   :  { %575 = vmatpush2.msra.mxu1 %v417_v49  ;;  %v423_v49 = vld [vmem:[#allocation2 + $0x380] sm:$0xff] }
  0x60   :  { %576 = vmatprep.subr.mxu1 %v414_v50  ;;  %v420_v50 = vld [vmem:[#allocation2 + $0x368] sm:$0xff] }
  0x61   :  { %577 = vmatpush2.msra.mxu1 %v413_v51  ;;  %v419_v51 = vld [vmem:[#allocation2 + $0x360] sm:$0xff] }
  0x62   :  { %578 = vmatprep.subr.mxu1 %v410_v52  ;;  %v416_v52 = vld [vmem:[#allocation2 + $0x348] sm:$0xff] }
  0x63   :  { %579 = vmatpush2.msra.mxu1 %v409_v53  ;;  %v415_v53 = vld [vmem:[#allocation2 + $0x340] sm:$0xff] }
  0x64   :  { %580 = vmatprep.subr.mxu1 %v406_v54  ;;  %v412_v54 = vld [vmem:[#allocation2 + $0x328] sm:$0xff] }
  0x65   :  { %581 = vmatpush2.msra.mxu1 %v405_v55  ;;  %v411_v55 = vld [vmem:[#allocation2 + $0x320] sm:$0xff] }
  0x66   :  { %582 = vmatprep.subr.mxu1 %v402_v56  ;;  %v408_v56 = vld [vmem:[#allocation2 + $0x308] sm:$0xff] }
  0x67   :  { %583 = vmatpush2.msra.mxu1 %v401_v57  ;;  %v407_v57 = vld [vmem:[#allocation2 + $0x300] sm:$0xff] }
  0x68   :  { %584 = vmatprep.subr.mxu1 %v398_v58  ;;  %v404_v58 = vld [vmem:[#allocation2 + $0x2e8] sm:$0xff] }
  0x69   :  { %585 = vmatpush2.msra.mxu1 %v397_v59  ;;  %v403_v59 = vld [vmem:[#allocation2 + $0x2e0] sm:$0xff] }
  0x8c   :  { %v63_v1 = vpop.permute.xlu0 %62 }
  0x8d   :  { %v69_v5 = vmul.f32 %v68_v2, %v63_v1  ;;  %v396_v1 = vld [vmem:[#allocation2 + $0x2a8] sm:$0xff]  ;;  %v395_v2 = vld [vmem:[#allocation2 + $0x2a0] sm:$0xff] }
  0x91   :  { %v72_v4 = vpop.permute.xlu0 %71 }
  0x92   :  { %v78_v6 = vmul.f32 %v77_v3, %v72_v4  ;;  %v392_v3 = vld [vmem:[#allocation2 + $0x288] sm:$0xff]  ;;  %v394_v4 = vld [vmem:[#allocation2 + $0x298] sm:$0xff] }
  0x93   :  { %586 = vmatprep.subr.mxu1 %v394_v4  ;;  %v667_v4 = vld [vmem:[%s1506_s10 + $0x1c0] sm:$0xff] }
  0x94   :  { %v79_v8 = vadd.f32 %v78_v6, %v69_v5  ;;  %v391_v5 = vld [vmem:[#allocation2 + $0x280] sm:$0xff]  ;;  %v393_v6 = vld [vmem:[#allocation2 + $0x290] sm:$0xff] }
  0x95   :  { %587 = vmatpush2.msra.mxu1 %v393_v6  ;;  %v651_v6 = vld [vmem:[%s1506_s10 + $0x140] sm:$0xff] }
  0x96   :  { %v87_v9 = vadd.f32 %v846_v7, %v79_v8  ;;  %v388_v7 = vld [vmem:[#allocation2 + $0x268] sm:$0xff]  ;;  %v390_v8 = vld [vmem:[#allocation2 + $0x278] sm:$0xff] }
  0x97   :  { %588 = vmatprep.subr.mxu1 %v390_v8  ;;  %v666_v8 = vld [vmem:[%s1506_s10 + $0x1b8] sm:$0xff] }
  0x98   :  { %v88_v10 = vmax.f32 %v87_v9, 0.0  ;;  %v387_v9 = vld [vmem:[#allocation2 + $0x260] sm:$0xff] }
  0x9a   :  { %218 = vmatmul.mubr.f32.vlgmr.msra.gmra.mxu0 %v88_v10  ;;  %v389_v10 = vld [vmem:[#allocation2 + $0x270] sm:$0xff] }
  0x9b   :  { %462 = vmatpush1.msra.mxu0 %v371_v11  ;;  %589 = vmatpush2.msra.mxu1 %v389_v10  ;;  %v384_v11 = vld [vmem:[#allocation2 + $0x248] sm:$0xff]  ;;  %v650_v10 = vld [vmem:[%s1506_s10 + $0x138] sm:$0xff] }
  0x9c   :  { %463 = vmatprep.subr.mxu0 %v368_v12  ;;  %v386_v12 = vld [vmem:[#allocation2 + $0x258] sm:$0xff] }
  0x9d   :  { %464 = vmatpush1.msra.mxu0 %v367_v13  ;;  %590 = vmatprep.subr.mxu1 %v386_v12  ;;  %v383_v13 = vld [vmem:[#allocation2 + $0x240] sm:$0xff]  ;;  %v665_v12 = vld [vmem:[%s1506_s10 + $0x1b0] sm:$0xff] }
  0x9e   :  { %465 = vmatprep.subr.mxu0 %v364_v14  ;;  %v385_v14 = vld [vmem:[#allocation2 + $0x250] sm:$0xff] }
  0x9f   :  { %466 = vmatpush1.msra.mxu0 %v363_v15  ;;  %591 = vmatpush2.msra.mxu1 %v385_v14  ;;  %v380_v15 = vld [vmem:[#allocation2 + $0x228] sm:$0xff]  ;;  %v649_v14 = vld [vmem:[%s1506_s10 + $0x130] sm:$0xff] }
  0xa0   :  { %467 = vmatprep.subr.mxu0 %v360_v16  ;;  %v382_v16 = vld [vmem:[#allocation2 + $0x238] sm:$0xff] }
  0xa1   :  { %468 = vmatpush1.msra.mxu0 %v359_v17  ;;  %592 = vmatprep.subr.mxu1 %v382_v16  ;;  %v379_v17 = vld [vmem:[#allocation2 + $0x220] sm:$0xff]  ;;  %v664_v16 = vld [vmem:[%s1506_s10 + $0x1a8] sm:$0xff] }
  0xa2   :  { %469 = vmatprep.subr.mxu0 %v356_v18  ;;  %v381_v18 = vld [vmem:[#allocation2 + $0x230] sm:$0xff] }
  0xa3   :  { %470 = vmatpush1.msra.mxu0 %v355_v19  ;;  %593 = vmatpush2.msra.mxu1 %v381_v18  ;;  %v376_v19 = vld [vmem:[#allocation2 + $0x208] sm:$0xff] }
  0xa4   :  { %471 = vmatprep.subr.mxu0 %v352_v20  ;;  %v378_v20 = vld [vmem:[#allocation2 + $0x218] sm:$0xff]  ;;  %v648_v18 = vld [vmem:[%s1506_s10 + $0x128] sm:$0xff] }
  0xa5   :  { %472 = vmatpush1.msra.mxu0 %v351_v21  ;;  %v375_v21 = vld [vmem:[#allocation2 + $0x200] sm:$0xff]  ;;  %594 = vmatprep.subr.mxu1 %v378_v20 }
  0xa6   :  { %473 = vmatprep.subr.mxu0 %v348_v22  ;;  %v377_v22 = vld [vmem:[#allocation2 + $0x210] sm:$0xff]  ;;  %v663_v20 = vld [vmem:[%s1506_s10 + $0x1a0] sm:$0xff] }
  0xa7   :  { %474 = vmatpush1.msra.mxu0 %v347_v23  ;;  %595 = vmatpush2.msra.mxu1 %v377_v22  ;;  %v642_v23 = vld [vmem:[%s1506_s10 + $0xf8] sm:$0xff]  ;;  %v647_v22 = vld [vmem:[%s1506_s10 + $0x120] sm:$0xff] }
  0xa8   :  { %475 = vmatprep.subr.mxu0 %v344_v24  ;;  %v674_v24 = vld [vmem:[%s1506_s10 + $0x1f8] sm:$0xff] }
  0xa9   :  { %476 = vmatpush1.msra.mxu0 %v343_v25  ;;  %882 = vmatprep.subr.mxu1 %v674_v24  ;;  %v295_v25 = vld [vmem:[%s1503_s7] sm:$0x3]  ;;  %v662_v24 = vld [vmem:[%s1506_s10 + $0x198] sm:$0xff] }
  0xaa   :  { %477 = vmatprep.subr.mxu0 %v340_v26 }
  0xab   :  { %478 = vmatpush1.msra.mxu0 %v339_v27 }
  0xac   :  { %479 = vmatprep.subr.mxu0 %v336_v28  ;;  %v300_v28 = vrot.slane %v295_v25, %v1270_v62 }
  0xad   :  { %480 = vmatpush1.msra.mxu0 %v335_v29 }
  0xae   :  { %481 = vmatprep.subr.mxu0 %v332_v30  ;;  %v304_v30 = vrot.slane %v295_v25, %v1273_v63  ;;  %v614_v25 = vld [vmem:[%s1506_s10 + $0x18] sm:$0xff] }
  0xaf   :  { %482 = vmatpush1.msra.mxu0 %v331_v31 }
  0xb0   :  { %483 = vmatprep.subr.mxu0 %v328_v32 }
  0xb1   :  { %484 = vmatpush1.msra.mxu0 %v327_v33 }
  0xb2   :  { %485 = vmatprep.subr.mxu0 %v324_v34 }
  0xb3   :  { %486 = vmatpush1.msra.mxu0 %v323_v35 }
  0xb4   :  { %487 = vmatprep.subr.mxu0 %v320_v36 }
  0xb5   :  { %488 = vmatpush1.msra.mxu0 %v319_v37 }
  0xb6   :  { %489 = vmatprep.subr.mxu0 %v316_v38  ;;  %v626_v38 = vld [vmem:[%s1506_s10 + $0x78] sm:$0xff] }
  0xb7   :  { %490 = vmatpush1.msra.mxu0 %v315_v39  ;;  %v658_v39 = vld [vmem:[%s1506_s10 + $0x178] sm:$0xff] }
  0xb8   :  { %491 = vmatprep.subr.mxu0 %v312_v40  ;;  %v641_v40 = vld [vmem:[%s1506_s10 + $0xf0] sm:$0xff] }
  0xb9   :  { %492 = vmatpush1.msra.mxu0 %v311_v41  ;;  %v673_v41 = vld [vmem:[%s1506_s10 + $0x1f0] sm:$0xff] }
  0xba   :  { %493 = vmatprep.subr.mxu0 %v436_v42  ;;  %v625_v42 = vld [vmem:[%s1506_s10 + $0x70] sm:$0xff] }
  0xbb   :  { %494 = vmatpush2.msra.mxu0 %v435_v43  ;;  %v657_v43 = vld [vmem:[%s1506_s10 + $0x170] sm:$0xff] }
  0xbc   :  { %495 = vmatprep.subr.mxu0 %v432_v44  ;;  %v640_v44 = vld [vmem:[%s1506_s10 + $0xe8] sm:$0xff] }
  0xbd   :  { %496 = vmatpush2.msra.mxu0 %v431_v45  ;;  %v672_v45 = vld [vmem:[%s1506_s10 + $0x1e8] sm:$0xff] }
  0xbe   :  { %497 = vmatprep.subr.mxu0 %v428_v46  ;;  %v624_v46 = vld [vmem:[%s1506_s10 + $0x68] sm:$0xff] }
  0xbf   :  { %498 = vmatpush2.msra.mxu0 %v427_v47  ;;  %v656_v47 = vld [vmem:[%s1506_s10 + $0x168] sm:$0xff] }
  0xc0   :  { %499 = vmatprep.subr.mxu0 %v424_v48  ;;  %v639_v48 = vld [vmem:[%s1506_s10 + $0xe0] sm:$0xff] }
  0xc1   :  { %500 = vmatpush2.msra.mxu0 %v423_v49  ;;  %v671_v49 = vld [vmem:[%s1506_s10 + $0x1e0] sm:$0xff] }
  0xc2   :  { %501 = vmatprep.subr.mxu0 %v420_v50  ;;  %v623_v50 = vld [vmem:[%s1506_s10 + $0x60] sm:$0xff] }
  0xc3   :  { %502 = vmatpush2.msra.mxu0 %v419_v51  ;;  %v655_v51 = vld [vmem:[%s1506_s10 + $0x160] sm:$0xff] }
  0xc4   :  { %503 = vmatprep.subr.mxu0 %v416_v52  ;;  %v638_v52 = vld [vmem:[%s1506_s10 + $0xd8] sm:$0xff] }
  0xc5   :  { %504 = vmatpush2.msra.mxu0 %v415_v53  ;;  %v670_v53 = vld [vmem:[%s1506_s10 + $0x1d8] sm:$0xff] }
  0xc6   :  { %505 = vmatprep.subr.mxu0 %v412_v54  ;;  %v622_v54 = vld [vmem:[%s1506_s10 + $0x58] sm:$0xff] }
  0xc7   :  { %506 = vmatpush2.msra.mxu0 %v411_v55  ;;  %v654_v55 = vld [vmem:[%s1506_s10 + $0x158] sm:$0xff] }
  0xc8   :  { %507 = vmatprep.subr.mxu0 %v408_v56  ;;  %v637_v56 = vld [vmem:[%s1506_s10 + $0xd0] sm:$0xff] }
  0xc9   :  { %508 = vmatpush2.msra.mxu0 %v407_v57  ;;  %v669_v57 = vld [vmem:[%s1506_s10 + $0x1d0] sm:$0xff] }
  0xca   :  { %509 = vmatprep.subr.mxu0 %v404_v58  ;;  %v621_v58 = vld [vmem:[%s1506_s10 + $0x50] sm:$0xff] }
  0xcb   :  { %510 = vmatpush2.msra.mxu0 %v403_v59  ;;  %v653_v59 = vld [vmem:[%s1506_s10 + $0x150] sm:$0xff] }
  0xcc   :  { %511 = vmatprep.subr.mxu0 %v400_v60  ;;  %v636_v60 = vld [vmem:[%s1506_s10 + $0xc8] sm:$0xff] }
  0xcd   :  { %512 = vmatpush2.msra.mxu0 %v399_v0  ;;  %v668_v0 = vld [vmem:[%s1506_s10 + $0x1c8] sm:$0xff] }
  0xce   :  { %513 = vmatprep.subr.mxu0 %v396_v1  ;;  %v620_v1 = vld [vmem:[%s1506_s10 + $0x48] sm:$0xff] }
  0xcf   :  { %514 = vmatpush2.msra.mxu0 %v395_v2  ;;  %v652_v2 = vld [vmem:[%s1506_s10 + $0x148] sm:$0xff] }
  0xd0   :  { %515 = vmatprep.subr.mxu0 %v392_v3  ;;  %v635_v3 = vld [vmem:[%s1506_s10 + $0xc0] sm:$0xff] }
  0xd1   :  { %516 = vmatpush2.msra.mxu0 %v391_v5  ;;  %v619_v5 = vld [vmem:[%s1506_s10 + $0x40] sm:$0xff] }
  0xd2   :  { %517 = vmatprep.subr.mxu0 %v388_v7  ;;  %v634_v7 = vld [vmem:[%s1506_s10 + $0xb8] sm:$0xff] }
  0xd3   :  { %518 = vmatpush2.msra.mxu0 %v387_v9  ;;  %v618_v9 = vld [vmem:[%s1506_s10 + $0x38] sm:$0xff] }
  0xd4   :  { %519 = vmatprep.subr.mxu0 %v384_v11  ;;  %v633_v11 = vld [vmem:[%s1506_s10 + $0xb0] sm:$0xff] }
  0xd5   :  { %520 = vmatpush2.msra.mxu0 %v383_v13  ;;  %v617_v13 = vld [vmem:[%s1506_s10 + $0x30] sm:$0xff] }
  0xd6   :  { %521 = vmatprep.subr.mxu0 %v380_v15  ;;  %v632_v15 = vld [vmem:[%s1506_s10 + $0xa8] sm:$0xff] }
  0xd7   :  { %522 = vmatpush2.msra.mxu0 %v379_v17  ;;  %v616_v17 = vld [vmem:[%s1506_s10 + $0x28] sm:$0xff] }
  0xd8   :  { %523 = vmatprep.subr.mxu0 %v376_v19  ;;  %v631_v19 = vld [vmem:[%s1506_s10 + $0xa0] sm:$0xff] }
  0xd9   :  { %524 = vmatpush2.msra.mxu0 %v375_v21  ;;  %v615_v21 = vld [vmem:[%s1506_s10 + $0x20] sm:$0xff] }
  0xda   :  { %847 = vmatprep.subr.mxu0 %v642_v23  ;;  %v630_v23 = vld [vmem:[%s1506_s10 + $0x98] sm:$0xff] }
  0xf2   :  { %v290_v26 = vpop.f32.mrf.mxu1 }
  0xf4   :  { %v292_v31 = vpop.f32.mrf.mxu1 }
 0x15a   :  { %v219_v27 = vpop.f32.mrf.mxu0 }
 0x15b   :  { %v291_v29 = vadd.f32 %v290_v26, %v219_v27  ;;  %v646_v26 = vld [vmem:[%s1506_s10 + $0x118] sm:$0xff]  ;;  %v629_v27 = vld [vmem:[%s1506_s10 + $0x90] sm:$0xff] }
 0x15c   :  { %v221_v32 = vpop.f32.mrf.mxu0 }
 0x15d   :  { %v293_v33 = vadd.f32 %v292_v31, %v221_v32  ;;  %v307_v34 = vadd.f32 %v300_v28, %v291_v29  ;;  %v661_v28 = vld [vmem:[%s1506_s10 + $0x190] sm:$0xff]  ;;  %v628_v31 = vld [vmem:[%s1506_s10 + $0x88] sm:$0xff] }
 0x15e   :  { %v613_v29 = vld [vmem:[%s1506_s10 + $0x10] sm:$0xff]  ;;  %v660_v32 = vld [vmem:[%s1506_s10 + $0x188] sm:$0xff] }
 0x15f   :  { %v308_v35 = vadd.f32 %v304_v30, %v293_v33  ;;  %v309_v37 = vmax.f32 %v307_v34, 0.0  ;;  %v645_v30 = vld [vmem:[%s1506_s10 + $0x110] sm:$0xff]  ;;  %v612_v33 = vld [vmem:[%s1506_s10 + $0x8] sm:$0xff] }
 0x160   :  { %v644_v34 = vld [vmem:[%s1506_s10 + $0x108] sm:$0xff] }
 0x161   :  { %v310_v36 = vmax.f32 %v308_v35, 0.0  ;;  %v627_v35 = vld [vmem:[%s1506_s10 + $0x80] sm:$0xff] }
 0x163   :  { %525 = vmatprep.mubr.f32.mxu0 %v310_v36  ;;  %596 = vmatprep.mubr.f32.mxu1 %v310_v36  ;;  %v659_v36 = vld [vmem:[%s1506_s10 + $0x180] sm:$0xff] }
 0x164   :  { %526 = vmatmul.mubr.f32.vlgmr.msra.gmra.mxu0 %v309_v37  ;;  %597 = vmatmul.mubr.f32.vlgmr.msra.gmra.mxu1 %v309_v37  ;;  %v611_v37 = vld [vmem:[%s1506_s10] sm:$0xff] }
 0x165   :  { %848 = vmatpush3.msra.mxu0 %v626_v38  ;;  %883 = vmatpush3.msra.mxu1 %v658_v39  ;;  %v643_v38 = vld [vmem:[%s1506_s10 + $0x100] sm:$0xff]  ;;  %v451_v39 = vsub.s32 2, %v1267_v61 }
 0x166   :  { %849 = vmatprep.subr.mxu0 %v641_v40  ;;  %884 = vmatprep.subr.mxu1 %v673_v41  ;;  %v439_v40 = vld [vmem:[%s1505_s9] sm:$0xf]  ;;  %v455_v41 = vsub.s32 3, %v1267_v61  ;;  %s999_s9 = smov [#allocation6]  }
 0x167   :  { %850 = vmatpush3.msra.mxu0 %v625_v42  ;;  %885 = vmatpush3.msra.mxu1 %v657_v43  ;;  %v444_v42 = vrot.slane %v439_v40, %v1270_v62  ;;  %v452_v43 = vrot.slane %v439_v40, %v451_v39  ;;  %s833_s22 = sshll.u32 %s999_s9, 4  ;;  %s834_s22 = int_to_ptr.vmem [resolvable:$true] %s833_s22 }
 0x168   :  { %851 = vmatprep.subr.mxu0 %v640_v44  ;;  %886 = vmatprep.subr.mxu1 %v672_v45  ;;  %v448_v44 = vrot.slane %v439_v40, %v1273_v63  ;;  %v456_v45 = vrot.slane %v439_v40, %v455_v41  ;;  %s947_s23 = scalar_lea.vmem %s834_s22, 512  ;;  %p952_p6 = scmp.lt.s32.totalorder %s834_s22, %s834_s22 }
 0x169   :  { %852 = vmatpush3.msra.mxu0 %v624_v46  ;;  %887 = vmatpush3.msra.mxu1 %v656_v47  ;;  %p948_p5 = scmp.ne.s32.totalorder %s834_s22, %s947_s23  ;;  %p953_p7 = scmp.lt.s32.totalorder %s947_s23, %s947_s23 }
 0x16a   :  { %853 = vmatprep.subr.mxu0 %v639_v48  ;;  %888 = vmatprep.subr.mxu1 %v671_v49 }
 0x16b   :  { %854 = vmatpush3.msra.mxu0 %v623_v50  ;;  %889 = vmatpush3.msra.mxu1 %v655_v51  ;;  %p954_p8 = por %p953_p7, %p952_p6 }
 0x16c   :  { %855 = vmatprep.subr.mxu0 %v638_v52  ;;  %890 = vmatprep.subr.mxu1 %v670_v53  ;;  %v58_v52 = vld [vmem:[%s1498_s2] sm:$0xff] }
 0x16d   :  { %856 = vmatpush3.msra.mxu0 %v622_v54  ;;  %891 = vmatpush3.msra.mxu1 %v654_v55  ;;  %p955_p9 = pnand %p954_p8, %p948_p5 }
 0x16e   :  { %857 = vmatprep.subr.mxu0 %v637_v56  ;;  %892 = vmatprep.subr.mxu1 %v669_v57 }
 0x16f   :  { %858 = vmatpush3.msra.mxu0 %v621_v58  ;;  %893 = vmatpush3.msra.mxu1 %v653_v59 }
 0x170   :  { %859 = vmatprep.subr.mxu0 %v636_v60  ;;  %894 = vmatprep.subr.mxu1 %v668_v0 }
 0x171   :  { %860 = vmatpush3.msra.mxu0 %v620_v1  ;;  %895 = vmatpush3.msra.mxu1 %v652_v2 }
 0x172   :  { %861 = vmatprep.subr.mxu0 %v635_v3  ;;  %896 = vmatprep.subr.mxu1 %v667_v4 }
 0x173   :  { %862 = vmatpush3.msra.mxu0 %v619_v5  ;;  %897 = vmatpush3.msra.mxu1 %v651_v6 }
 0x174   :  { %863 = vmatprep.subr.mxu0 %v634_v7  ;;  %898 = vmatprep.subr.mxu1 %v666_v8 }
 0x175   :  { %864 = vmatpush3.msra.mxu0 %v618_v9  ;;  %899 = vmatpush3.msra.mxu1 %v650_v10 }
 0x176   :  { %865 = vmatprep.subr.mxu0 %v633_v11  ;;  %900 = vmatprep.subr.mxu1 %v665_v12 }
 0x177   :  { %866 = vmatpush3.msra.mxu0 %v617_v13  ;;  %901 = vmatpush3.msra.mxu1 %v649_v14 }
 0x178   :  { %867 = vmatprep.subr.mxu0 %v632_v15  ;;  %902 = vmatprep.subr.mxu1 %v664_v16 }
 0x179   :  { %868 = vmatpush3.msra.mxu0 %v616_v17  ;;  %903 = vmatpush3.msra.mxu1 %v648_v18 }
 0x17a   :  { %869 = vmatprep.subr.mxu0 %v631_v19  ;;  %904 = vmatprep.subr.mxu1 %v663_v20 }
 0x17b   :  { %870 = vmatpush3.msra.mxu0 %v615_v21  ;;  %905 = vmatpush3.msra.mxu1 %v647_v22 }
 0x17c   :  { %871 = vmatprep.subr.mxu0 %v630_v23  ;;  %906 = vmatprep.subr.mxu1 %v662_v24 }
 0x17d   :  { %872 = vmatpush3.msra.mxu0 %v614_v25  ;;  %907 = vmatpush3.msra.mxu1 %v646_v26 }
 0x17e   :  { %873 = vmatprep.subr.mxu0 %v629_v27  ;;  %908 = vmatprep.subr.mxu1 %v661_v28 }
 0x17f   :  { %874 = vmatpush3.msra.mxu0 %v613_v29  ;;  %909 = vmatpush3.msra.mxu1 %v645_v30 }
 0x180   :  { %875 = vmatprep.subr.mxu0 %v628_v31  ;;  %910 = vmatprep.subr.mxu1 %v660_v32 }
 0x181   :  { %876 = vmatpush3.msra.mxu0 %v612_v33  ;;  %911 = vmatpush3.msra.mxu1 %v644_v34 }
 0x182   :  { %877 = vmatprep.subr.mxu0 %v627_v35  ;;  %912 = vmatprep.subr.mxu1 %v659_v36 }
 0x183   :  { %878 = vmatpush3.msra.mxu0 %v611_v37  ;;  %913 = vmatpush3.msra.mxu1 %v643_v38 }
 0x224   :  { %v527_v46 = vpop.f32.mrf.mxu0  ;;  %v598_v47 = vpop.f32.mrf.mxu1 }
 0x225   :  { %v528_v48 = vadd.f32 %v527_v46, %v444_v42  ;;  %v599_v49 = vadd.f32 %v598_v47, %v452_v43 }
 0x226   :  { %v529_v50 = vpop.f32.mrf.mxu0  ;;  %v600_v51 = vpop.f32.mrf.mxu1 }
 0x227   :  { %603 = vst [vmem:[#allocation6] sm:$0xff] %v528_v48  ;;  %605 = vst [vmem:[#allocation6 + $0x10] sm:$0xff] %v599_v49  ;;  %v530_v53 = vadd.f32 %v529_v50, %v448_v44  ;;  %v601_v61 = vadd.f32 %v600_v51, %v456_v45  ;;  %v607_v63 = vmul.f32 %v528_v48, %v58_v52 }
 0x228   :  { %v609_v55 = vmul.f32 %v599_v49, %v58_v52 }
 0x229   :  { %604 = vst [vmem:[#allocation6 + $0x8] sm:$0xff] %v530_v53  ;;  %v608_v62 = vmul.f32 %v530_v53, %v58_v52  ;;  %606 = vst [vmem:[#allocation6 + $0x18] sm:$0xff] %v601_v61  ;;  %v610_v54 = vmul.f32 %v601_v61, %v58_v52 }
 0x22b   :  { %739 = vmatprep.mubr.f32.mxu0 %v608_v62  ;;  %809 = vmatprep.mubr.f32.mxu1 %v610_v54 }
 0x22c   :  { %740 = vmatmul.mubr.f32.vlgmr.msra.gmra.mxu0 %v607_v63  ;;  %810 = vmatmul.mubr.f32.vlgmr.msra.gmra.mxu1 %v609_v55 }
 0x22d   :  { %958 = shalt.err (!%p955_p9)
}
 0x22e   :  { %836 = dma.vmem_to_hbm [thread:$0]  %s834_s22, 512, %s1508_s12, [#allocation7]   ;;  %vm815_vm0 = vcmask 64512  }
 0x22f   :  { %s1000_s25 = smov [#allocation5]  }
 0x230   :  { %s823_s26 = sshll.u32 %s1000_s25, 4  ;;  %s824_s26 = int_to_ptr.vmem [resolvable:$true] %s823_s26 }
 0x231   :  { %s967_s27 = scalar_lea.vmem %s824_s26, 128  ;;  %p972_p11 = scmp.lt.s32.totalorder %s824_s26, %s824_s26 }
 0x232   :  { %p968_p10 = scmp.ne.s32.totalorder %s824_s26, %s967_s27  ;;  %p973_p12 = scmp.lt.s32.totalorder %s967_s27, %s967_s27 }
 0x234   :  { %p974_p13 = por %p973_p12, %p972_p11 }
 0x236   :  { %p975_p0 = pnand %p974_p13, %p968_p10 }
 0x2ec   :  { %v879_v56 = vpop.f32.mrf.mxu0  ;;  %v914_v57 = vpop.f32.mrf.mxu1 }
 0x2ee   :  { %v880_v58 = vpop.f32.mrf.mxu0  ;;  %v915_v59 = vpop.f32.mrf.mxu1 }
 0x2ef   :  { %v881_v60 = vadd.f32 %v880_v58, %v879_v56  ;;  %v916_v0 = vadd.f32 %v915_v59, %v914_v57 }
 0x2f1   :  { %v812_v1 = vadd.f32 %v916_v0, %v881_v60 }
 0x2f3   :  { %816 = vst.msk [vmem:[#allocation5] sm:$0xff] %vm815_vm0, %v812_v1 }
 0x2f4   :  { %978 = shalt.err (!%p975_p0)
}
 0x2f5   :  { %826 = dma.vmem_to_hbm [thread:$0]  %s824_s26, 128, %s1507_s11, [#allocation4]  }
 0x2f6   :  { %989 = dma.done.wait [#allocation4], 128  }
 0x2f7   :  { %990 = vsyncadd [#allocation4], 4294967168 }
 0x2f8   :  { %991 = dma.done.wait [#allocation7], 512  }
 0x2f9   :  { %992 = vsyncadd [#allocation7], 4294966784 }
 0x2fa   :  { %843 = vsyncpa [#allocation3], 1 }
 0x2fb   :  { %844 = vsyncpa [#allocation4], 1 }
 0x2fc   :  { %845 = vsyncpa [#allocation7], 1 }

</bundles_post_ra>
